<compile_context>
chip_gen: v7x
topology: tpu7x:2x2x1
jax: 0.10.0
libtpu: 0.0.40
codegen_flags: <defaults>
</compile_context>

<pallas_src>
import math

import jax
import jax.numpy as jnp
from jax import lax
from jax.experimental import pallas as pl
from jax.experimental.pallas import tpu as pltpu


# ----------------------------------------------------------------------------
# tiling helper
# ----------------------------------------------------------------------------
def _pick_tile(n, cap, align):
    """Largest divisor of n that is <= cap and a multiple of `align`;
    falls back to the full dimension (no tiling) if none exists."""
    if n <= cap:
        return n
    t = (cap // align) * align
    while t >= align:
        if n % t == 0:
            return t
        t -= align
    return n


# ----------------------------------------------------------------------------
# Kernel 1: streaming prep pass over adjacency row blocks.
#   yt    (2, N): fused projections  yt[c, m] = sum_d W[d, c] X[m, d]
#   d_in  (1, N): row sums of A      (in-degree of dst nodes)
#   d_out (1, N): column sums of A   (out-degree of src nodes, accumulated)
# ----------------------------------------------------------------------------
def _prep_kernel(a_ref, x_ref, wt_ref, yt_ref, din_ref, dout_ref):
    i = pl.program_id(0)
    a = a_ref[...].astype(jnp.float32)                       # (tm1, N)
    x = x_ref[...].astype(jnp.float32)                       # (tm1, D)

    # fused score projections (one skinny MXU op instead of two)
    yt_ref[...] = lax.dot_general(
        wt_ref[...], x, (((1,), (1,)), ((), ())),
        preferred_element_type=jnp.float32)                  # (2, tm1)

    # in-degree of this row block, produced lane-dense via an MXU matvec
    ones_row = jnp.ones((1, a.shape[1]), jnp.float32)
    din_ref[...] = lax.dot_general(
        ones_row, a, (((1,), (1,)), ((), ())),
        preferred_element_type=jnp.float32)                  # (1, tm1)

    # out-degree: accumulate column sums across row blocks
    @pl.when(i == 0)
    def _():
        dout_ref[...] = jnp.zeros_like(dout_ref)

    dout_ref[...] += jnp.sum(a, axis=0, keepdims=True)       # (1, N)


# ----------------------------------------------------------------------------
# Kernel 2: tiled normalized matvec + score finalize (lane-dense (1, N) output)
#   acc[0, m] = sum_j A[m, j] * inv_sqrt_out[j] * y1[j]
#   score[m]  = max(inv_sqrt_in[m] * acc[m] + b1, y2[m] + b2)
# ----------------------------------------------------------------------------
def _score_kernel(a_ref, ytk_ref, dout_ref, yti_ref, din_ref, b1_ref, b2_ref,
                  score_ref, acc_ref):
    k = pl.program_id(1)

    @pl.when(k == 0)
    def _():
        acc_ref[...] = jnp.zeros_like(acc_ref)

    a = a_ref[...].astype(jnp.float32)                       # (tm, tk)
    inv_out = lax.rsqrt(jnp.maximum(dout_ref[...], 1.0))     # (1, tk)
    z = inv_out * ytk_ref[0:1, :]                            # (1, tk)
    # A_hat is never materialized: the column scaling rides on z,
    # the row scaling is applied at finalize.
    acc_ref[...] += lax.dot_general(
        z, a, (((1,), (1,)), ((), ())),
        preferred_element_type=jnp.float32)                  # (1, tm)

    @pl.when(k == pl.num_programs(1) - 1)
    def _():
        inv_in = lax.rsqrt(jnp.maximum(din_ref[...], 1.0))   # (1, tm)
        s1 = inv_in * acc_ref[...] + b1_ref[0, 0]
        s2 = yti_ref[1:2, :] + b2_ref[0, 0]
        score_ref[...] = jnp.maximum(s1, s2)                 # (1, tm)


def compute_scores(adj, feature, w1, b1, w2, b2):
    n, d = feature.shape
    wt = jnp.concatenate([w1, w2], axis=1).T.astype(jnp.float32)   # (2, D)

    # ---- pass 1: degrees + fused projections -------------------------------
    row_cap = max(8, min(512, (4 << 20) // max(4 * n, 1)))   # keep A block ~<=4MB
    tm1 = _pick_tile(n, row_cap, 8)
    yt, d_in, d_out = pl.pallas_call(
        _prep_kernel,
        out_shape=(jax.ShapeDtypeStruct((2, n), jnp.float32),
                   jax.ShapeDtypeStruct((1, n), jnp.float32),
                   jax.ShapeDtypeStruct((1, n), jnp.float32)),
        grid=(n // tm1,),
        in_specs=[
            pl.BlockSpec((tm1, n), lambda i: (i, 0)),
            pl.BlockSpec((tm1, d), lambda i: (i, 0)),
            pl.BlockSpec((2, d), lambda i: (0, 0)),
        ],
        out_specs=(
            pl.BlockSpec((2, tm1), lambda i: (0, i)),
            pl.BlockSpec((1, tm1), lambda i: (0, i)),
            pl.BlockSpec((1, n), lambda i: (0, 0)),      # resident accumulator
        ),
        compiler_params=pltpu.CompilerParams(
            dimension_semantics=("arbitrary",)),
    )(adj, feature, wt)

    # ---- pass 2: tiled normalized matvec + score ----------------------------
    tm = _pick_tile(n, 512, 8)
    tk = _pick_tile(n, 1024, 128)
    score_row = pl.pallas_call(
        _score_kernel,
        out_shape=jax.ShapeDtypeStruct((1, n), jnp.float32),
        grid=(n // tm, n // tk),
        in_specs=[
            pl.BlockSpec((tm, tk), lambda i, k: (i, k)),     # A block
            pl.BlockSpec((2, tk), lambda i, k: (0, k)),      # y (column block)
            pl.BlockSpec((1, tk), lambda i, k: (0, k)),      # d_out (col block)
            pl.BlockSpec((2, tm), lambda i, k: (0, i)),      # y (row block)
            pl.BlockSpec((1, tm), lambda i, k: (0, i)),      # d_in (row block)
            pl.BlockSpec(memory_space=pltpu.MemorySpace.SMEM),   # b1 scalar
            pl.BlockSpec(memory_space=pltpu.MemorySpace.SMEM),   # b2 scalar
        ],
        out_specs=pl.BlockSpec((1, tm), lambda i, k: (0, i)),
        scratch_shapes=[pltpu.VMEM((1, tm), jnp.float32)],
        compiler_params=pltpu.CompilerParams(
            dimension_semantics=("parallel", "arbitrary")),
    )(adj, yt, d_out, yt, d_in, b1, b2)
    return score_row[0]                                      # (N,)


# ----------------------------------------------------------------------------
# Kernel 3: fused gather + tanh scale.  perm is scalar-prefetched; feature rows
# are gathered via a data-dependent index_map (block size 1 along nodes), so
# feature[perm] is never materialized in HBM.
# ----------------------------------------------------------------------------
def _gather_scale_kernel(perm_ref, x_ref, s_ref, o_ref):
    del perm_ref                                             # used by index_maps
    o_ref[...] = x_ref[...] * jnp.tanh(s_ref[...])           # (1,1,D) * (1,1,1)


def gather_scale(feature, score, perm):
    n, d = feature.shape
    k = perm.shape[0]
    feature3 = feature.reshape(n, 1, d)
    score_perm = score[perm].reshape(k, 1, 1)
    pooled = pl.pallas_call(
        _gather_scale_kernel,
        out_shape=jax.ShapeDtypeStruct((k, 1, d), jnp.float32),
        grid_spec=pltpu.PrefetchScalarGridSpec(
            num_scalar_prefetch=1,
            grid=(k,),
            in_specs=[
                pl.BlockSpec((1, 1, d), lambda i, perm: (perm[i], 0, 0)),
                pl.BlockSpec((1, 1, 1), lambda i, perm: (i, 0, 0)),
            ],
            out_specs=pl.BlockSpec((1, 1, d), lambda i, perm: (i, 0, 0)),
        ),
        compiler_params=pltpu.CompilerParams(
            dimension_semantics=("parallel",)),
    )(perm.astype(jnp.int32), feature3, score_perm)
    return pooled.reshape(k, d)


# ----------------------------------------------------------------------------
# Glue: per-graph top-k (batch_num_nodes are static python ints)
# ----------------------------------------------------------------------------
def topk_per_graph(score, ratio, batch_num_nodes):
    perms, next_nums = [], []
    offset = 0
    for n in batch_num_nodes:
        k = max(1, int(math.ceil(ratio * n)))
        seg = jax.lax.dynamic_slice(score, (offset,), (n,))
        _, idx = jax.lax.top_k(seg, k)                       # sorted descending
        perms.append(idx + offset)
        next_nums.append(k)
        offset += n
    return jnp.concatenate(perms), next_nums


# ----------------------------------------------------------------------------
# The full Pool forward
# ----------------------------------------------------------------------------
def pool_forward(adj, feature, params, ratio, batch_num_nodes):
    w1, b1, w2, b2 = params
    score = compute_scores(adj, feature, w1, b1, w2, b2)     # (N,)
    perm, next_batch_num_nodes = topk_per_graph(score, ratio, batch_num_nodes)
    pooled = gather_scale(feature, score, perm)              # (K, D)
    # single fused advanced-index gather (no (K, N) intermediate)
    sub_adj = adj[perm[:, None], perm[None, :]]
    # TODO(synk): dgl.node_subgraph also carries edge IDs / graph metadata;
    # only the induced dense adjacency + next batch sizes are returned here.
    return sub_adj, pooled, perm, next_batch_num_nodes


# ----------------------------------------------------------------------------
# Deterministic parameter init (GraphConv: xavier weight + zero bias;
# Linear: uniform weight/bias). Synthetic — not a checkpoint load.
# ----------------------------------------------------------------------------
def init_params(key, in_dim):
    k1, k2, k3 = jax.random.split(key, 3)
    lim1 = math.sqrt(6.0 / (in_dim + 1))                     # xavier-uniform
    w1 = jax.random.uniform(k1, (in_dim, 1), jnp.float32, -lim1, lim1)
    b1 = jnp.zeros((1, 1), jnp.float32)
    lim2 = 1.0 / math.sqrt(in_dim)
    w2 = jax.random.uniform(k2, (in_dim, 1), jnp.float32, -lim2, lim2)
    b2 = jax.random.uniform(k3, (1, 1), jnp.float32, -lim2, lim2)
    return w1, b1, w2, b2


def ring_adjacency(n):
    idx = jnp.arange(n)
    a = jnp.zeros((n, n), jnp.float32)
    a = a.at[idx, (idx + 1) % n].set(1.0)
    a = a.at[idx, (idx - 1) % n].set(1.0)
    return a


def ref_forward(adj, feature, params, ratio, batch_num_nodes):
    """Pure-JAX reference for correctness check (naive formulation)."""
    w1, b1, w2, b2 = params
    d_in = adj.sum(1, keepdims=True)
    d_out = adj.sum(0, keepdims=True)
    a_hat = adj / jnp.sqrt(jnp.maximum(d_in, 1.0)) / jnp.sqrt(jnp.maximum(d_out, 1.0))
    s1 = a_hat @ feature @ w1 + b1
    s2 = feature @ w2 + b2
    score = jnp.maximum(s1, s2)[:, 0]
    perm, next_nums = topk_per_graph(score, ratio, batch_num_nodes)
    pooled = feature[perm] * jnp.tanh(score[perm])[:, None]
    return pooled, perm, next_nums


if __name__ == "__main__":
    in_dim = 32
    ratio = 0.5
    batch_num_nodes = [8, 8]                                 # batch of 2 graphs
    n_total = sum(batch_num_nodes)

    key = jax.random.PRNGKey(0)
    k_feat, k_par = jax.random.split(key)
    feature = jax.random.normal(k_feat, (n_total, in_dim), jnp.float32)
    # block-diagonal adjacency: two 8-node ring graphs (every node degree 2)
    adj = jax.scipy.linalg.block_diag(*[ring_adjacency(n) for n in batch_num_nodes])
    adj = adj.astype(jnp.float32)
    params = init_params(k_par, in_dim)

    sub_adj, pooled, perm, next_nums = pool_forward(
        adj, feature, params, ratio, batch_num_nodes)
    jax.block_until_ready((sub_adj, pooled, perm))

    # correctness check against pure-JAX reference
    ref_pooled, ref_perm, ref_nums = ref_forward(
        adj, feature, params, ratio, batch_num_nodes)
    assert next_nums == ref_nums
    assert bool(jnp.all(perm == ref_perm))
    assert bool(jnp.allclose(pooled, ref_pooled, rtol=5e-3, atol=5e-3))
    assert pooled.shape == (sum(next_nums), in_dim)
    assert sub_adj.shape == (sum(next_nums), sum(next_nums))

    print("KERNEL_OK")
</pallas_src>

<mosaic_0001>
module attributes {stable_mosaic.version = 11 : i64} {
  func.func @_prep_kernel(%arg0: i32, %arg1: memref<16x16xf32, #tpu.memory_space<vmem>>, %arg2: memref<16x32xf32, #tpu.memory_space<vmem>>, %arg3: memref<2x32xf32, #tpu.memory_space<vmem>>, %arg4: memref<2x16xf32, #tpu.memory_space<vmem>>, %arg5: memref<1x16xf32, #tpu.memory_space<vmem>>, %arg6: memref<1x16xf32, #tpu.memory_space<vmem>>) attributes {dimension_semantics = [#tpu.dimension_semantics<arbitrary>], iteration_bounds = array<i64: 1>, scalar_prefetch = 0 : i64, scratch_operands = 0 : i64, tpu.core_type = #tpu.core_type<tc>, window_params = [{transform_indices = @transform_0, window_bounds = array<i64: 16, 16>}, {transform_indices = @transform_1, window_bounds = array<i64: 16, 32>}, {pipeline_mode = #tpu.pipeline_mode<synchronous>, transform_indices = @transform_2, window_bounds = array<i64: 2, 32>}, {transform_indices = @transform_3, window_bounds = array<i64: 2, 16>}, {transform_indices = @transform_4, window_bounds = array<i64: 1, 16>}, {pipeline_mode = #tpu.pipeline_mode<synchronous>, transform_indices = @transform_5, window_bounds = array<i64: 1, 16>}]} {
    %c0 = arith.constant 0 : index
    %c0_0 = arith.constant 0 : index
    %0 = vector.load %arg1[%c0, %c0_0] : memref<16x16xf32, #tpu.memory_space<vmem>>, vector<16x16xf32>
    %c0_1 = arith.constant 0 : index
    %c0_2 = arith.constant 0 : index
    %1 = vector.load %arg2[%c0_1, %c0_2] : memref<16x32xf32, #tpu.memory_space<vmem>>, vector<16x32xf32>
    %c0_3 = arith.constant 0 : index
    %c0_4 = arith.constant 0 : index
    %2 = vector.load %arg3[%c0_3, %c0_4] : memref<2x32xf32, #tpu.memory_space<vmem>>, vector<2x32xf32>
    %cst = arith.constant dense<0.000000e+00> : vector<2x16xf32>
    %3 = tpu.matmul %2, %1, %cst {dimension_numbers = #tpu.dot_dimension_numbers<[1], [1], [0], [0], [0, 0, 1, 0], [], []>} : vector<2x32xf32>, vector<16x32xf32>, vector<2x16xf32> -> vector<2x16xf32>
    %c0_5 = arith.constant 0 : index
    %c0_6 = arith.constant 0 : index
    %4 = vector.load %arg4[%c0_5, %c0_6] : memref<2x16xf32, #tpu.memory_space<vmem>>, vector<2x16xf32>
    tpu.vector_store %arg4[%c0_5, %c0_6], %3 {strides = array<i32>} : memref<2x16xf32, #tpu.memory_space<vmem>>, vector<2x16xf32>,
    %cst_7 = arith.constant 1.000000e+00 : f32
    %5 = vector.broadcast %cst_7 : f32 to vector<1x16xf32>
    %cst_8 = arith.constant dense<0.000000e+00> : vector<1x16xf32>
    %6 = tpu.matmul %5, %0, %cst_8 {dimension_numbers = #tpu.dot_dimension_numbers<[1], [1], [0], [0], [0, 0, 1, 0], [], []>} : vector<1x16xf32>, vector<16x16xf32>, vector<1x16xf32> -> vector<1x16xf32>
    %c0_9 = arith.constant 0 : index
    %c0_10 = arith.constant 0 : index
    %7 = vector.load %arg5[%c0_9, %c0_10] : memref<1x16xf32, #tpu.memory_space<vmem>>, vector<1x16xf32>
    tpu.vector_store %arg5[%c0_9, %c0_10], %6 {strides = array<i32>} : memref<1x16xf32, #tpu.memory_space<vmem>>, vector<1x16xf32>,
    %c0_i32 = arith.constant 0 : i32
    %8 = arith.cmpi eq, %arg0, %c0_i32 : i32
    %9 = arith.extui %8 : i1 to i32
    %c0_i32_11 = arith.constant 0 : i32
    %10 = arith.cmpi ne, %9, %c0_i32_11 : i32
    scf.if %10 {
      %cst_17 = arith.constant 0.000000e+00 : f32
      %16 = vector.broadcast %cst_17 : f32 to vector<1x16xf32>
      %c0_18 = arith.constant 0 : index
      %c0_19 = arith.constant 0 : index
      %17 = vector.load %arg6[%c0_18, %c0_19] : memref<1x16xf32, #tpu.memory_space<vmem>>, vector<1x16xf32>
      tpu.vector_store %arg6[%c0_18, %c0_19], %16 {strides = array<i32>} : memref<1x16xf32, #tpu.memory_space<vmem>>, vector<1x16xf32>,
    } else {
    }
    %c0_12 = arith.constant 0 : index
    %c0_13 = arith.constant 0 : index
    %11 = vector.load %arg6[%c0_12, %c0_13] : memref<1x16xf32, #tpu.memory_space<vmem>>, vector<1x16xf32>
    %cst_14 = arith.constant dense<0.000000e+00> : vector<16xf32>
    %12 = vector.multi_reduction <add>, %0, %cst_14 [0] : vector<16x16xf32> to vector<16xf32>
    %13 = vector.shape_cast %12 : vector<16xf32> to vector<1x16xf32>
    %14 = arith.addf %11, %13 : vector<1x16xf32>
    %c0_15 = arith.constant 0 : index
    %c0_16 = arith.constant 0 : index
    %15 = vector.load %arg6[%c0_15, %c0_16] : memref<1x16xf32, #tpu.memory_space<vmem>>, vector<1x16xf32>
    tpu.vector_store %arg6[%c0_15, %c0_16], %14 {strides = array<i32>} : memref<1x16xf32, #tpu.memory_space<vmem>>, vector<1x16xf32>,
    return
  }
  func.func @transform_0(%arg0: i32) -> (i32, i32) {
    %c0_i32 = arith.constant 0 : i32
    %c0_i32_0 = arith.constant 0 : i32
    return %arg0, %c0_i32 : i32, i32
  }
  func.func @transform_1(%arg0: i32) -> (i32, i32) {
    %c0_i32 = arith.constant 0 : i32
    %c0_i32_0 = arith.constant 0 : i32
    return %arg0, %c0_i32 : i32, i32
  }
  func.func @transform_2(%arg0: i32) -> (i32, i32) {
    %c0_i32 = arith.constant 0 : i32
    %c0_i32_0 = arith.constant 0 : i32
    %c0_i32_1 = arith.constant 0 : i32
    return %c0_i32, %c0_i32_0 : i32, i32
  }
  func.func @transform_3(%arg0: i32) -> (i32, i32) {
    %c0_i32 = arith.constant 0 : i32
    %c0_i32_0 = arith.constant 0 : i32
    return %c0_i32, %arg0 : i32, i32
  }
  func.func @transform_4(%arg0: i32) -> (i32, i32) {
    %c0_i32 = arith.constant 0 : i32
    %c0_i32_0 = arith.constant 0 : i32
    return %c0_i32, %arg0 : i32, i32
  }
  func.func @transform_5(%arg0: i32) -> (i32, i32) {
    %c0_i32 = arith.constant 0 : i32
    %c0_i32_0 = arith.constant 0 : i32
    %c0_i32_1 = arith.constant 0 : i32
    return %c0_i32, %c0_i32_0 : i32, i32
  }
}

</mosaic_0001>

<bundles_post_ra>
// kernel: tpu_custom_call.1
= control target key start
LH: loop header
LB: loop body
LE: loop exit
PB: predicated region body
PF: predicated region fallthrough
CT: control target
= control target key end

     0   :  { %11 = vsyncpa [#allocation3], 0  ;;  %s570_s0 = inlined_call_operand.hbm [shape: f32[16,16], index: 0, kind: input, shape index: {}]   ;;  %s571_s1 = inlined_call_operand.hbm [shape: f32[16,32], index: 1, kind: input, shape index: {}]   ;;  %s572_s2 = inlined_call_operand.vmem [shape: f32[2,32], index: 2, kind: input, shape index: {}]   ;;  %s573_s3 = inlined_call_operand.hbm [shape: f32[2,16], index: 3, kind: output, shape index: {0}]   ;;  %s574_s4 = inlined_call_operand.hbm [shape: f32[1,16], index: 4, kind: output, shape index: {1}]   ;;  %s575_s5 = inlined_call_operand.hbm [shape: f32[1,16], index: 5, kind: output, shape index: {2}]  }
   0x1   :  { %12 = vsyncpa [#allocation6], 0 }
   0x2   :  { %13 = vsyncpa [#allocation4], 0 }
   0x3   :  { %14 = vsyncpa [#allocation9], 0  ;;  %s439_s18 = smov [#allocation2]   ;;  %s321_s22 = scalar_lea.hbm %s570_s0, 256 }
   0x4   :  { %s20_s19 = sshll.u32 %s439_s18, 4  ;;  %p322_p0 = scmp.ne.s32.totalorder %s570_s0, %s321_s22  ;;  %s21_s19 = int_to_ptr.vmem [resolvable:$true] %s20_s19 }
   0x5   :  { %p325_p1 = scmp.lt.u32.totalorder %s321_s22, %s570_s0 }
   0x7   :  { %p327_p2 = pnand %p325_p1, %p322_p0 }
   0x9   :  { %330 = shalt.err (!%p327_p2)
}
   0xa   :  { %s331_s27 = scalar_lea.vmem %s21_s19, 256  ;;  %p336_p4 = scmp.lt.s32.totalorder %s21_s19, %s21_s19 }
   0xb   :  { %p332_p3 = scmp.ne.s32.totalorder %s21_s19, %s331_s27  ;;  %p337_p5 = scmp.lt.s32.totalorder %s331_s27, %s331_s27 }
   0xd   :  { %p338_p6 = por %p337_p5, %p336_p4 }
   0xf   :  { %p339_p7 = pnand %p338_p6, %p332_p3 }
  0x11   :  { %342 = shalt.err (!%p339_p7)
}
  0x12   :  { %s440_s28 = smov 128   ;;  %s441_s29 = smov 8  }
  0x13   :  { %26 = dma.hbm_to_vmem [thread:$0]  %s570_s0, 256, %s21_s19, [#allocation3], %s440_s28, %s440_s28, %s441_s29  }
  0x14   :  { %s442_s7 = smov [#allocation5]   ;;  %s343_s11 = scalar_lea.hbm %s571_s1, 256 }
  0x15   :  { %s32_s8 = sshll.u32 %s442_s7, 4  ;;  %p344_p8 = scmp.ne.s32.totalorder %s571_s1, %s343_s11  ;;  %s33_s8 = int_to_ptr.vmem [resolvable:$true] %s32_s8 }
  0x16   :  { %p347_p9 = scmp.lt.u32.totalorder %s343_s11, %s571_s1 }
  0x18   :  { %p349_p10 = pnand %p347_p9, %p344_p8 }
  0x1a   :  { %352 = shalt.err (!%p349_p10)
}
  0x1b   :  { %s353_s16 = scalar_lea.vmem %s33_s8, 256  ;;  %p358_p12 = scmp.lt.s32.totalorder %s33_s8, %s33_s8 }
  0x1c   :  { %p354_p11 = scmp.ne.s32.totalorder %s33_s8, %s353_s16  ;;  %p359_p13 = scmp.lt.s32.totalorder %s353_s16, %s353_s16 }
  0x1e   :  { %p360_p0 = por %p359_p13, %p358_p12 }
  0x20   :  { %p361_p1 = pnand %p360_p0, %p354_p11 }
  0x22   :  { %364 = shalt.err (!%p361_p1)
}
  0x23   :  { %38 = dma.hbm_to_vmem [thread:$0]  %s571_s1, 256, %s33_s8, [#allocation6], %s440_s28, %s440_s28, %s441_s29  }
  0x24   :  { %431 = dma.done.wait [#allocation3], 256  }
  0x25   :  { %432 = vsyncadd [#allocation3], 4294967040 }
  0x26   :  { %433 = dma.done.wait [#allocation6], 256  }
  0x27   :  { %434 = vsyncadd [#allocation6], 4294967040  ;;  %v443_v0 = vmov 0.0|0.0   ;;  %vm214_vm0 = vcmask 122880   ;;  %vm444_vm1 = vmmov 0   ;;  %v445_v1 = vmov 0.0  }
  0x28   :  { %302 = vmatprep.subr.bf16.mxu0 %v443_v0  ;;  %306 = vmatprep.subr.bf16.mxu1 %v443_v0  ;;  %220 = vst.msk [vmem:[#allocation10] sm:$0x1] %vm214_vm0, %v445_v1  ;;  %vm52_vm2 = vcmask 261120   ;;  %vm134_vm3 = vcmask 130048   ;;  %v49_v2 = vld [vmem:[#allocation5] sm:$0xff]  ;;  %v50_v3 = vld [vmem:[#allocation5 + $0x8] sm:$0xff] }
  0x29   :  { %292 = vmatprep.mubr.msk.f32.mxu0 %vm444_vm1, %v445_v1  ;;  %299 = vmatprep.mubr.msk.f32.mxu1 %vm444_vm1, %v445_v1  ;;  %vm304_vm4 = vmpackc.low %vm52_vm2, %vm52_vm2  ;;  %v47_v4 = vld [vmem:[#allocation2] sm:$0xff]  ;;  %v303_v5 = vpack.c.bf16 %v50_v3, %v49_v2  ;;  %v48_v6 = vld [vmem:[#allocation2 + $0x8] sm:$0xff]  ;;  %v446_v12 = vmov 1.0   ;;  %s447_s19 = smov [#allocation7]   ;;  %s448_s21 = smov [#allocation8]   ;;  %vm132_vm6 = vcmask 123904  }
  0x2a   :  { %vm308_vm5 = vmpackc.low %vm134_vm3, %vm134_vm3  ;;  %v222_v7 = vsel %vm134_vm3, %v47_v4, 0.0  ;;  %v307_v8 = vpack.c.bf16 %v48_v6, %v47_v4  ;;  %v223_v9 = vsel %vm134_vm3, %v48_v6, 0.0  ;;  %v51_v11 = vld [vmem:[%s572_s2] sm:$0x3]  ;;  %s239_s20 = sshll.u32 %s447_s19, 4  ;;  %s249_s22 = sshll.u32 %s448_s21, 4  ;;  %s240_s20 = int_to_ptr.vmem [resolvable:$true] %s239_s20  ;;  %s517_s22 = int_to_ptr.vmem [resolvable:$true] %s249_s22 }
  0x2b   :  { %305 = vmatpush3.bf16.xpose.msk.msra.mxu0 %vm304_vm4, %v303_v5  ;;  %v224_v10 = vadd.f32 %v223_v9, %v222_v7  ;;  %s449_s2 = smov [#allocation10]   ;;  %s365_s24 = scalar_lea.vmem %s240_s20, 32 }
  0x2c   :  { %309 = vmatpush3.bf16.xpose.msk.msra.mxu1 %vm308_vm5, %v307_v8  ;;  %s259_s23 = sshll.u32 %s449_s2, 4  ;;  %p366_p2 = scmp.ne.s32.totalorder %s240_s20, %s365_s24  ;;  %s519_s23 = int_to_ptr.vmem [resolvable:$true] %s259_s23 }
  0x2d   :  { %v225_v13 = vrot.slane %v224_v10, 4  ;;  %p370_p3 = scmp.lt.s32.totalorder %s240_s20, %s240_s20  ;;  %p371_p4 = scmp.lt.s32.totalorder %s365_s24, %s365_s24 }
  0x2f   :  { %v226_v14 = vadd.f32 %v225_v13, %v224_v10  ;;  %v221_v19 = vld [vmem:[#allocation10] sm:$0x1]  ;;  %p372_p5 = por %p371_p4, %p370_p3 }
  0x31   :  { %v227_v15 = vrot.slane %v226_v14, 2  ;;  %p373_p6 = pnand %p372_p5, %p366_p2 }
  0x32   :  { %293 = vmatmul.mubr.msk.f32.vlgmr.msra.gmra.mrb[0].mxu0 %vm52_vm2, %v51_v11 }
  0x33   :  { %300 = vmatmul.mubr.msk.f32.vlgmr.msra.gmra.mrb[0].mxu1 %vm134_vm3, %v446_v12  ;;  %v228_v16 = vadd.f32 %v227_v15, %v226_v14 }
  0x35   :  { %v229_v17 = vrot.slane %v228_v16, 1 }
  0x37   :  { %v230_v18 = vadd.f32 %v229_v17, %v228_v16 }
  0x39   :  { %v231_v20 = vadd.f32 %v230_v18, %v221_v19 }
  0x3b   :  { %232 = vst.msk [vmem:[#allocation10] sm:$0x1] %vm214_vm0, %v231_v20 }
 0x105   :  { %v128_v21 = vpop.f32.mrb[0].mxu0 }
 0x106   :  { %v210_v22 = vpop.f32.mrb[0].mxu1  ;;  %v294_v23 = vpop.f32.mrb[1].mxu0  ;;  %133 = vst.msk [vmem:[#allocation7] sm:$0x3] %vm132_vm6, %v128_v21 }
 0x107   :  { %215 = vst.msk [vmem:[#allocation8] sm:$0x1] %vm214_vm0, %v210_v22  ;;  %v301_v24 = vpop.f32.mrb[1].mxu1 }
 0x108   :  { %376 = shalt.err (!%p373_p6)
}
 0x109   :  { %s377_s27 = scalar_lea.hbm %s573_s3, 32 }
 0x10a   :  { %p378_p7 = scmp.ne.s32.totalorder %s573_s3, %s377_s27  ;;  %p381_p8 = scmp.lt.u32.totalorder %s377_s27, %s573_s3 }
 0x10c   :  { %p383_p9 = pnand %p381_p8, %p378_p7 }
 0x10e   :  { %386 = shalt.err (!%p383_p9)
}
 0x10f   :  { %242 = dma.vmem_to_hbm [thread:$0]  %s240_s20, 32, %s573_s3, [#allocation4]  }
 0x110   :  { %s387_s9 = scalar_lea.vmem %s517_s22, 16  ;;  %s391_s10 = scalar_lea.vmem %s517_s22, 32 }
 0x111   :  { %p388_p10 = scmp.ne.s32.totalorder %s517_s22, %s387_s9  ;;  %p392_p11 = scmp.lt.s32.totalorder %s517_s22, %s517_s22 }
 0x112   :  { %p393_p12 = scmp.lt.s32.totalorder %s391_s10, %s387_s9 }
 0x114   :  { %p394_p13 = por %p393_p12, %p392_p11 }
 0x116   :  { %p395_p0 = pnand %p394_p13, %p388_p10 }
 0x118   :  { %398 = shalt.err (!%p395_p0)
}
 0x119   :  { %s399_s13 = scalar_lea.hbm %s574_s4, 16 }
 0x11a   :  { %p400_p1 = scmp.ne.s32.totalorder %s574_s4, %s399_s13  ;;  %p403_p2 = scmp.lt.u32.totalorder %s399_s13, %s574_s4 }
 0x11c   :  { %p405_p3 = pnand %p403_p2, %p400_p1 }
 0x11e   :  { %408 = shalt.err (!%p405_p3)
}
 0x11f   :  { %252 = dma.vmem_to_hbm [thread:$0]  %s517_s22, 16, %s574_s4, [#allocation9]  }
 0x120   :  { %s409_s1 = scalar_lea.vmem %s519_s23, 16  ;;  %s413_s18 = scalar_lea.vmem %s519_s23, 32 }
 0x121   :  { %p410_p4 = scmp.ne.s32.totalorder %s519_s23, %s409_s1  ;;  %p414_p5 = scmp.lt.s32.totalorder %s519_s23, %s519_s23 }
 0x122   :  { %p415_p6 = scmp.lt.s32.totalorder %s413_s18, %s409_s1 }
 0x124   :  { %p416_p7 = por %p415_p6, %p414_p5 }
 0x126   :  { %p417_p8 = pnand %p416_p7, %p410_p4 }
 0x128   :  { %420 = shalt.err (!%p417_p8)
}
 0x129   :  { %s421_s21 = scalar_lea.hbm %s575_s5, 16 }
 0x12a   :  { %p422_p9 = scmp.ne.s32.totalorder %s575_s5, %s421_s21  ;;  %p425_p10 = scmp.lt.u32.totalorder %s421_s21, %s575_s5 }
 0x12c   :  { %p427_p11 = pnand %p425_p10, %p422_p9 }
 0x12e   :  { %430 = shalt.err (!%p427_p11)
}
 0x12f   :  { %262 = dma.vmem_to_hbm [thread:$0]  %s519_s23, 16, %s575_s5, [#allocation9]  }
 0x130   :  { %435 = dma.done.wait [#allocation4], 32  }
 0x131   :  { %436 = vsyncadd [#allocation4], 4294967264 }
 0x132   :  { %437 = dma.done.wait [#allocation9], 32  }
 0x133   :  { %438 = vsyncadd [#allocation9], 4294967264 }
 0x134   :  { %272 = vsyncpa [#allocation3], 1 }
 0x135   :  { %273 = vsyncpa [#allocation6], 1 }
 0x136   :  { %274 = vsyncpa [#allocation4], 1 }
 0x137   :  { %275 = vsyncpa [#allocation9], 1 }

</bundles_post_ra>
